<compile_context>
chip_gen: v5e
topology: v5e:2x2
jax: 0.10.0
libtpu: 0.0.40
codegen_flags: <defaults>
</compile_context>

<pallas_src>
import functools

import jax
import jax.numpy as jnp
from jax.experimental import pallas as pl
from jax.experimental.pallas import tpu as pltpu


def _layernorm_kernel(x_ref, a_ref, b_ref, o_ref, *, eps, features, approx):
    # x_ref: (tile_rows, features); a_ref / b_ref: (1, features), already f32.
    x = x_ref[...].astype(jnp.float32)
    mean = jnp.mean(x, axis=-1, keepdims=True)
    centered = x - mean
    # torch.std default is unbiased: divide by (N - 1).
    var = jnp.sum(centered * centered, axis=-1, keepdims=True) * (1.0 / (features - 1))
    denom = jnp.sqrt(var) + eps          # eps added to STD, per the torch module
    if approx:
        # Optional EUP vrcp (~1e-4 relative error). Off by default: the
        # reciprocal is per-ROW, not per-element, so exact costs nothing here.
        inv = pl.reciprocal(denom, approx=True)
    else:
        inv = 1.0 / denom                # exact; fully hidden under HBM traffic
    o_ref[...] = (a_ref[...] * (centered * inv) + b_ref[...]).astype(o_ref.dtype)


def _vmem_limit_bytes():
    """Scoped-VMEM limit to request (v5e/v6e: 128 MiB phys, v7x: 64 MiB)."""
    default = 64 * 1024 * 1024
    try:
        info = pltpu.get_tpu_info()
        cap = getattr(info, "vmem_capacity_bytes", None)
        if cap is None:
            return default
        # Leave headroom for compiler scratch; never ask for more than 96 MiB.
        return int(min(cap * 3 // 4, 96 * 1024 * 1024))
    except Exception:
        return default


def _round_up(x, m):
    return ((x + m - 1) // m) * m


_TARGET_BLOCK_BYTES = 4 * 1024 * 1024    # ~4 MiB input blocks -> >=85% HBM roofline


def _select_tile_rows(rows, features, itemsize, vmem_limit_bytes):
    """Pick a row tile that (a) fits the double-buffered working set in the
    scoped-VMEM budget, (b) targets a ~4 MiB input block to amortize the
    per-grid-step overhead, and (c) keeps >=4 (even) grid steps so the DMA
    pipeline overlaps and both v7x TensorCores receive balanced shards."""
    if rows < 64:
        # Tiny problem: one block covering everything. A block dim equal to
        # the full array dim is always legal, even if rows % 8 != 0, and
        # pipelining buys nothing at this size.
        return rows

    # VMEM working set per row: double-buffered input + output blocks in the
    # native dtype, plus ~12 B/elem of live f32 temporaries inside the body
    # (x_f32, centered, and the scaled product can all be live at once).
    per_row_bytes = features * (4 * itemsize + 12)
    t_vmem = max(vmem_limit_bytes // max(per_row_bytes, 1), 16)
    t_target = max(_TARGET_BLOCK_BYTES // max(features * itemsize, 1), 16)
    t_cap = max((min(t_vmem, t_target) // 16) * 16, 16)   # 16-aligned (bf16 vregs)

    # Block count: at least what the cap forces, never fewer than 4, and even
    # so v7x's two TensorCores split the parallel axis evenly.
    n_blocks = max(pl.cdiv(rows, t_cap), 4)
    if n_blocks % 2:
        n_blocks += 1

    # 16-aligned tile for that block count; cdiv(rows, n_blocks) <= t_cap and
    # t_cap is a multiple of 16, so rounding up cannot exceed the VMEM cap.
    return _round_up(pl.cdiv(rows, n_blocks), 16)
    # NOTE: if blocks end up < ~1 MiB for a given workload, sweeping
    # pipeline_mode=pl.Buffered(3) on the x/out BlockSpecs is a further
    # low-single-digit-% lever (not enabled by default).


def layer_norm(x, a_2, b_2, eps=1e-6, tile_rows=None, approx_reciprocal=False):
    """x: arbitrary-rank array, normalized over the last dim (= features)."""
    orig_shape = x.shape
    features = orig_shape[-1]
    if features < 2:
        raise ValueError("features must be >= 2 (unbiased std divides by N-1)")

    x2 = x.reshape(-1, features)
    rows = x2.shape[0]
    itemsize = jnp.dtype(x.dtype).itemsize

    vmem_limit = _vmem_limit_bytes()
    if tile_rows is None:
        tile_rows = _select_tile_rows(rows, features, itemsize, vmem_limit)

    # gamma/beta passed as f32 (1, F) so no per-grid-step casts in-kernel.
    a2 = a_2.astype(jnp.float32).reshape(1, features)
    b2 = b_2.astype(jnp.float32).reshape(1, features)

    kernel = functools.partial(
        _layernorm_kernel,
        eps=float(eps),
        features=features,
        approx=approx_reciprocal,
    )

    # Advisory cost estimate so XLA schedules around this mem-bound op.
    cost = pl.CostEstimate(
        flops=7 * rows * features,
        transcendentals=2 * rows,                       # sqrt + reciprocal per row
        bytes_accessed=2 * rows * features * itemsize + 2 * features * 4,
    )

    grid = (pl.cdiv(rows, tile_rows),)                  # partial last block is masked

    out = pl.pallas_call(
        kernel,
        out_shape=jax.ShapeDtypeStruct((rows, features), x.dtype),
        grid_spec=pltpu.PrefetchScalarGridSpec(
            num_scalar_prefetch=0,
            grid=grid,
            in_specs=[
                pl.BlockSpec((tile_rows, features), lambda i: (i, 0)),
                pl.BlockSpec((1, features), lambda i: (0, 0)),   # gamma resident
                pl.BlockSpec((1, features), lambda i: (0, 0)),   # beta resident
            ],
            out_specs=pl.BlockSpec((tile_rows, features), lambda i: (i, 0)),
        ),
        compiler_params=pltpu.CompilerParams(
            dimension_semantics=("parallel",),          # shards rows across TCs on v7x
            vmem_limit_bytes=vmem_limit,
        ),
        cost_estimate=cost,
    )(x2, a2, b2)

    return out.reshape(orig_shape)


def _reference(x, a_2, b_2, eps):
    mean = jnp.mean(x, axis=-1, keepdims=True)
    std = jnp.std(x, axis=-1, keepdims=True, ddof=1)    # unbiased, matches torch
    return a_2 * (x - mean) / (std + eps) + b_2


if __name__ == "__main__":
    key = jax.random.PRNGKey(0)
    eps = 1e-6
    hidden = 128                                         # lane-dense feature dim

    k1, k2, k3 = jax.random.split(key, 3)
    # nn.Parameter(torch.ones(features)) / torch.zeros(features), perturbed a
    # bit so the affine path is actually exercised.
    a_2 = jnp.ones((hidden,), dtype=jnp.float32) + 0.1 * jax.random.normal(
        k2, (hidden,), dtype=jnp.float32
    )
    b_2 = jnp.zeros((hidden,), dtype=jnp.float32) + 0.05

    # Case 1: (batch=2, seq=8, hidden=128) -- small single-block path.
    x = jax.random.normal(k1, (2, 8, hidden), dtype=jnp.float32)
    out = jax.block_until_ready(layer_norm(x, a_2, b_2, eps=eps))
    ref = _reference(x, a_2, b_2, eps)
    assert jnp.allclose(out, ref, atol=1e-4, rtol=1e-4), "mismatch vs reference"

    # Case 2: ragged row count (15 rows, not a multiple of 8) -- full-array block.
    x_r = jax.random.normal(k3, (3, 5, hidden), dtype=jnp.float32)
    out_r = jax.block_until_ready(layer_norm(x_r, a_2, b_2, eps=eps))
    ref_r = _reference(x_r, a_2, b_2, eps)
    assert jnp.allclose(out_r, ref_r, atol=1e-4, rtol=1e-4), "ragged mismatch"

    # Case 3: rows >= 64 -- multi-block grid with a partial last block.
    x_m = jax.random.normal(key, (5, 16, hidden), dtype=jnp.float32)
    out_m = jax.block_until_ready(layer_norm(x_m, a_2, b_2, eps=eps))
    ref_m = _reference(x_m, a_2, b_2, eps)
    assert jnp.allclose(out_m, ref_m, atol=1e-4, rtol=1e-4), "multi-block mismatch"

    print("KERNEL_OK")
</pallas_src>

<mosaic_0001>
module attributes {stable_mosaic.version = 11 : i64} {
  func.func @_layernorm_kernel(%arg0: i32, %arg1: memref<16x128xf32, #tpu.memory_space<vmem>>, %arg2: memref<1x128xf32, #tpu.memory_space<vmem>>, %arg3: memref<1x128xf32, #tpu.memory_space<vmem>>, %arg4: memref<16x128xf32, #tpu.memory_space<vmem>>) attributes {dimension_semantics = [#tpu.dimension_semantics<parallel>], iteration_bounds = array<i64: 1>, scalar_prefetch = 0 : i64, scratch_operands = 0 : i64, tpu.core_type = #tpu.core_type<tc>, window_params = [{transform_indices = @transform_0, window_bounds = array<i64: 16, 128>}, {pipeline_mode = #tpu.pipeline_mode<synchronous>, transform_indices = @transform_1, window_bounds = array<i64: 1, 128>}, {pipeline_mode = #tpu.pipeline_mode<synchronous>, transform_indices = @transform_2, window_bounds = array<i64: 1, 128>}, {transform_indices = @transform_3, window_bounds = array<i64: 16, 128>}]} {
    %c0 = arith.constant 0 : index
    %c0_0 = arith.constant 0 : index
    %0 = vector.load %arg1[%c0, %c0_0] : memref<16x128xf32, #tpu.memory_space<vmem>>, vector<16x128xf32>
    %cst = arith.constant dense<0.000000e+00> : vector<16xf32>
    %1 = vector.multi_reduction <add>, %0, %cst [1] : vector<16x128xf32> to vector<16xf32>
    %2 = vector.shape_cast %1 : vector<16xf32> to vector<16x1xf32>
    %cst_1 = arith.constant 1.280000e+02 : f32
    %3 = vector.broadcast %cst_1 : f32 to vector<16x1xf32>
    %4 = arith.divf %2, %3 : vector<16x1xf32>
    %5 = vector.broadcast %4 : vector<16x1xf32> to vector<16x128xf32>
    %6 = arith.subf %0, %5 : vector<16x128xf32>
    %7 = arith.mulf %6, %6 : vector<16x128xf32>
    %cst_2 = arith.constant dense<0.000000e+00> : vector<16xf32>
    %8 = vector.multi_reduction <add>, %7, %cst_2 [1] : vector<16x128xf32> to vector<16xf32>
    %9 = vector.shape_cast %8 : vector<16xf32> to vector<16x1xf32>
    %cst_3 = arith.constant 0.00787401571 : f32
    %10 = vector.broadcast %cst_3 : f32 to vector<16x1xf32>
    %11 = arith.mulf %9, %10 : vector<16x1xf32>
    %12 = math.sqrt %11 : vector<16x1xf32>
    %cst_4 = arith.constant 9.99999997E-7 : f32
    %13 = vector.broadcast %cst_4 : f32 to vector<16x1xf32>
    %14 = arith.addf %12, %13 : vector<16x1xf32>
    %cst_5 = arith.constant 1.000000e+00 : f32
    %15 = vector.broadcast %cst_5 : f32 to vector<16x1xf32>
    %16 = arith.divf %15, %14 : vector<16x1xf32>
    %c0_6 = arith.constant 0 : index
    %c0_7 = arith.constant 0 : index
    %17 = vector.load %arg2[%c0_6, %c0_7] : memref<1x128xf32, #tpu.memory_space<vmem>>, vector<1x128xf32>
    %18 = vector.broadcast %16 : vector<16x1xf32> to vector<16x128xf32>
    %19 = arith.mulf %6, %18 : vector<16x128xf32>
    %20 = vector.broadcast %17 : vector<1x128xf32> to vector<16x128xf32>
    %21 = arith.mulf %20, %19 : vector<16x128xf32>
    %c0_8 = arith.constant 0 : index
    %c0_9 = arith.constant 0 : index
    %22 = vector.load %arg3[%c0_8, %c0_9] : memref<1x128xf32, #tpu.memory_space<vmem>>, vector<1x128xf32>
    %23 = vector.broadcast %22 : vector<1x128xf32> to vector<16x128xf32>
    %24 = arith.addf %21, %23 : vector<16x128xf32>
    %c0_10 = arith.constant 0 : index
    %c0_11 = arith.constant 0 : index
    %25 = vector.load %arg4[%c0_10, %c0_11] : memref<16x128xf32, #tpu.memory_space<vmem>>, vector<16x128xf32>
    tpu.vector_store %arg4[%c0_10, %c0_11], %24 {strides = array<i32>} : memref<16x128xf32, #tpu.memory_space<vmem>>, vector<16x128xf32>,
    return
  }
  func.func @transform_0(%arg0: i32) -> (i32, i32) {
    %c0_i32 = arith.constant 0 : i32
    %c0_i32_0 = arith.constant 0 : i32
    return %arg0, %c0_i32 : i32, i32
  }
  func.func @transform_1(%arg0: i32) -> (i32, i32) {
    %c0_i32 = arith.constant 0 : i32
    %c0_i32_0 = arith.constant 0 : i32
    %c0_i32_1 = arith.constant 0 : i32
    return %c0_i32, %c0_i32_0 : i32, i32
  }
  func.func @transform_2(%arg0: i32) -> (i32, i32) {
    %c0_i32 = arith.constant 0 : i32
    %c0_i32_0 = arith.constant 0 : i32
    %c0_i32_1 = arith.constant 0 : i32
    return %c0_i32, %c0_i32_0 : i32, i32
  }
  func.func @transform_3(%arg0: i32) -> (i32, i32) {
    %c0_i32 = arith.constant 0 : i32
    %c0_i32_0 = arith.constant 0 : i32
    return %arg0, %c0_i32 : i32, i32
  }
}

</mosaic_0001>

<bundles_post_ra>
// kernel: tpu_custom_call.1
= control target key start
LH: loop header
LB: loop body
LE: loop exit
PB: predicated region body
PF: predicated region fallthrough
CT: control target
= control target key end

     0   :  { %8 = vsyncpa [#allocation3], 0  ;;  %s307_s0 = inlined_call_operand.hbm [shape: f32[16,128], index: 0, kind: input, shape index: {}]   ;;  %s308_s1 = inlined_call_operand.hbm [shape: f32[1,128], index: 1, kind: input, shape index: {}]   ;;  %s309_s2 = inlined_call_operand.vmem [shape: f32[1,128], index: 2, kind: input, shape index: {}]   ;;  %s310_s3 = inlined_call_operand.hbm [shape: f32[16,128], index: 3, kind: output, shape index: {}]  }
   0x1   :  { %9 = vsyncpa [#allocation6], 0 }
   0x2   :  { %10 = vsyncpa [#allocation4], 0  ;;  %s15_s14 = sshll.u32 %s307_s0, 4  ;;  %s258_s15 = smov [#allocation2]   ;;  %s16_s14 = int_to_ptr.hbm [resolvable:$true] %s15_s14 }
   0x3   :  { %s17_s16 = sshll.u32 %s258_s15, 4  ;;  %s29_s19 = sshll.u32 %s308_s1, 4  ;;  %s18_s16 = int_to_ptr.vmem [resolvable:$true] %s17_s16  ;;  %s30_s19 = int_to_ptr.hbm [resolvable:$true] %s29_s19 }
   0x4   :  { %s259_s20 = smov 128   ;;  %s260_s21 = smov 8  }
   0x5   :  { %23 = dma.hbm_to_vmem [thread:$0]  %s16_s14, 256, %s18_s16, [#allocation3], %s259_s20, %s259_s20, %s260_s21  }
   0x6   :  { %s261_s22 = smov [#allocation5]  }
   0x7   :  { %s31_s23 = sshll.u32 %s261_s22, 4  ;;  %s32_s23 = int_to_ptr.vmem [resolvable:$true] %s31_s23 }
   0x8   :  { %34 = dma.hbm_to_vmem [thread:$0]  %s30_s19, 16, %s32_s23, [#allocation6]  }
   0x9   :  { %252 = dma.done.wait [#allocation3], 256  }
   0xa   :  { %253 = vsyncadd [#allocation3], 4294967040 }
   0xb   :  { %254 = dma.done.wait [#allocation6], 16  }
   0xc   :  { %255 = vsyncadd [#allocation6], 4294967280  ;;  %v45_v0 = vld [vmem:[#allocation2] sm:$0xff]  ;;  %v46_v1 = vld [vmem:[#allocation2 + $0x8] sm:$0xff]  ;;  %v262_v2 = vmov 128.0   ;;  %s263_s24 = smov [#allocation7]  }
   0xd   :  { %47 = vadd.xlane.f32.xlu0 %v45_v0  ;;  %170 = vrcp.f32 %v262_v2  ;;  %v168_v54 = vld [vmem:[#allocation5] ss:$0 sm:$0xff]  ;;  %v169_v58 = vld [vmem:[%s309_s2] ss:$0 sm:$0xff]  ;;  %s146_s25 = sshll.u32 %s263_s24, 4  ;;  %s148_s27 = sshll.u32 %s310_s3, 4  ;;  %s147_s25 = int_to_ptr.vmem [resolvable:$true] %s146_s25  ;;  %s149_s27 = int_to_ptr.hbm [resolvable:$true] %s148_s27 }
  0x13   :  { %v171_v3 = vpop.eup %170 }
  0x14   :  { %v52_v4 = vmul.f32 128.0, %v171_v3  ;;  %vm56_vm0 = vweird.f32 %v171_v3 }
  0x15   :  { %49 = vadd.xlane.f32.xlu0 %v46_v1 }
  0x16   :  { %v53_v5 = vsub.f32 1.0, %v52_v4 }
  0x18   :  { %v54_v6 = vmul.f32 %v171_v3, %v53_v5 }
  0x1a   :  { %v55_v7 = vadd.f32 %v171_v3, %v54_v6 }
  0x1c   :  { %v57_v8 = vsel %vm56_vm0, %v171_v3, %v55_v7 }
  0x80   :  { %v48_v9 = vpop.xlane.xlu0 %47 }
  0x81   :  { %v58_v10 = vmul.f32 %v57_v8, %v48_v9 }
  0x83   :  { %v60_v11 = vsub.f32 %v45_v0, %v58_v10 }
  0x85   :  { %v62_v12 = vmul.f32 %v60_v11, %v60_v11 }
  0x87   :  { %64 = vadd.xlane.f32.xlu1 %v62_v12 }
  0x88   :  { %v50_v13 = vpop.xlane.xlu0 %49 }
  0x89   :  { %v59_v14 = vmul.f32 %v57_v8, %v50_v13 }
  0x8b   :  { %v293_v15 = vsub.f32 %v46_v1, %v59_v14 }
  0x8d   :  { %v63_v16 = vmul.f32 %v293_v15, %v293_v15 }
  0x8f   :  { %66 = vadd.xlane.f32.xlu1 %v63_v16 }
  0xfa   :  { %v65_v17 = vpop.xlane.xlu1 %64 }
  0xfb   :  { %v68_v18 = vmul.f32 0.007874016, %v65_v17 }
  0xfd   :  { %172 = vrsqrt.f32 %v68_v18  ;;  %vm77_vm1 = vcmp.eq.f32.partialorder %v68_v18, inf  ;;  %v80_v31 = vand.u32 2147483648, %v68_v18  ;;  %vm79_vm2 = vcmp.eq.f32.partialorder %v68_v18, 0.0 }
 0x102   :  { %v67_v19 = vpop.xlane.xlu1 %66 }
 0x103   :  { %v173_v20 = vpop.eup %172  ;;  %v69_v21 = vmul.f32 0.007874016, %v67_v19 }
 0x104   :  { %v71_v22 = vmul.f32 %v173_v20, %v68_v18 }
 0x105   :  { %174 = vrsqrt.f32 %v69_v21  ;;  %vm89_vm3 = vcmp.eq.f32.partialorder %v69_v21, inf  ;;  %v92_v39 = vand.u32 2147483648, %v69_v21  ;;  %vm91_vm4 = vcmp.eq.f32.partialorder %v69_v21, 0.0 }
 0x106   :  { %v72_v23 = vmul.f32 %v173_v20, %v71_v22 }
 0x108   :  { %v73_v24 = vmul.f32 0.5, %v72_v23 }
 0x10a   :  { %v74_v25 = vsub.f32 1.5, %v73_v24 }
 0x10b   :  { %v175_v26 = vpop.eup %174 }
 0x10c   :  { %v75_v27 = vmul.f32 %v173_v20, %v74_v25  ;;  %v83_v28 = vmul.f32 %v175_v26, %v69_v21 }
 0x10e   :  { %v76_v29 = vmul.f32 %v75_v27, %v68_v18  ;;  %v84_v30 = vmul.f32 %v175_v26, %v83_v28 }
 0x110   :  { %v78_v32 = vsel %vm77_vm1, %v68_v18, %v76_v29  ;;  %v85_v33 = vmul.f32 0.5, %v84_v30 }
 0x111   :  { %v81_v34 = vsel %vm79_vm2, %v80_v31, %v78_v32 }
 0x112   :  { %v94_v35 = vadd.f32 1e-06, %v81_v34  ;;  %v86_v36 = vsub.f32 1.5, %v85_v33 }
 0x114   :  { %176 = vrcp.f32 %v94_v35  ;;  %v87_v37 = vmul.f32 %v175_v26, %v86_v36  ;;  %v107_v46 = vand.u32 2147483648, %v94_v35  ;;  %v105_v48 = vand.u32 2147483647, %v94_v35 }
 0x115   :  { %vm101_vm6 = vweird.f32 %v94_v35 }
 0x116   :  { %v88_v38 = vmul.f32 %v87_v37, %v69_v21  ;;  %v108_v51 = vor.u32 1.1754944e-38, %v107_v46  ;;  %vm106_vm8 = vcmp.eq.f32.partialorder %v105_v48, 8.507059e+37 }
 0x118   :  { %v90_v40 = vsel %vm89_vm3, %v69_v21, %v88_v38 }
 0x119   :  { %v93_v41 = vsel %vm91_vm4, %v92_v39, %v90_v40 }
 0x11a   :  { %v177_v42 = vpop.eup %176  ;;  %v95_v43 = vadd.f32 1e-06, %v93_v41 }
 0x11b   :  { %v97_v44 = vmul.f32 %v177_v42, %v94_v35  ;;  %vm102_vm5 = vweird.f32 %v177_v42 }
 0x11c   :  { %178 = vrcp.f32 %v95_v43  ;;  %vm103_vm7 = vmor %vm101_vm6, %vm102_vm5  ;;  %v122_v59 = vand.u32 2147483648, %v95_v43  ;;  %v120_v61 = vand.u32 2147483647, %v95_v43  ;;  %vm116_vm10 = vweird.f32 %v95_v43 }
 0x11d   :  { %v98_v45 = vsub.f32 1.0, %v97_v44 }
 0x11e   :  { %v123_v1 = vor.u32 1.1754944e-38, %v122_v59  ;;  %vm121_vm12 = vcmp.eq.f32.partialorder %v120_v61, 8.507059e+37 }
 0x11f   :  { %v99_v47 = vmul.f32 %v177_v42, %v98_v45 }
 0x121   :  { %v100_v49 = vadd.f32 %v177_v42, %v99_v47 }
 0x122   :  { %v179_v50 = vpop.eup %178 }
 0x123   :  { %v104_v52 = vsel %vm103_vm7, %v177_v42, %v100_v49  ;;  %v112_v53 = vmul.f32 %v179_v50, %v95_v43  ;;  %vm117_vm9 = vweird.f32 %v179_v50 }
 0x124   :  { %v109_v55 = vsel %vm106_vm8, %v108_v51, %v104_v52  ;;  %vm118_vm11 = vmor %vm116_vm10, %vm117_vm9 }
 0x125   :  { %v113_v56 = vsub.f32 1.0, %v112_v53  ;;  %v127_v57 = vmul.f32 %v109_v55, %v60_v11 }
 0x127   :  { %v114_v60 = vmul.f32 %v179_v50, %v113_v56  ;;  %v132_v62 = vmul.f32 %v168_v54, %v127_v57 }
 0x129   :  { %v115_v63 = vadd.f32 %v179_v50, %v114_v60  ;;  %v138_v0 = vadd.f32 %v169_v58, %v132_v62 }
 0x12b   :  { %v119_v2 = vsel %vm118_vm11, %v179_v50, %v115_v63  ;;  %140 = vst [vmem:[#allocation7] sm:$0xff] %v138_v0 }
 0x12c   :  { %v124_v3 = vsel %vm121_vm12, %v123_v1, %v119_v2 }
 0x12d   :  { %v128_v4 = vmul.f32 %v124_v3, %v293_v15 }
 0x12f   :  { %v133_v5 = vmul.f32 %v168_v54, %v128_v4 }
 0x131   :  { %v139_v6 = vadd.f32 %v169_v58, %v133_v5 }
 0x133   :  { %141 = vst [vmem:[#allocation7 + $0x8] sm:$0xff] %v139_v6 }
 0x134   :  { %154 = dma.vmem_to_hbm [thread:$0]  %s147_s25, 256, %s149_s27, [#allocation4], %s259_s20, %s259_s20, %s260_s21  }
 0x135   :  { %256 = dma.done.wait [#allocation4], 256  }
 0x136   :  { %257 = vsyncadd [#allocation4], 4294967040 }
 0x137   :  { %159 = vsyncpa [#allocation3], 1 }
 0x138   :  { %160 = vsyncpa [#allocation6], 1 }
 0x139   :  { %161 = vsyncpa [#allocation4], 1 }

</bundles_post_ra>
